<compile_context>
chip_gen: v6e
topology: v6e:2x2x1
jax: 0.10.0
libtpu: 0.0.40
codegen_flags: <defaults>
</compile_context>

<pallas_src>
import jax
import jax.numpy as jnp
from jax.experimental import pallas as pl
from jax.experimental.pallas import tpu as pltpu


_LANE = 128
_ROW = 8


def _round_up(a, b):
    return (a + b - 1) // b * b


def _vmem_config():
    """Per-generation (block_budget_bytes, vmem_limit_bytes)."""
    try:
        cap = pltpu.get_tpu_info().vmem_capacity_bytes
    except Exception:
        cap = 64 * 1024 * 1024                      # conservative fallback (v7x-sized)
    if cap >= 96 * 1024 * 1024:                     # v5e / v6e: 128 MiB physical VMEM
        return 8 * 1024 * 1024, 64 * 1024 * 1024
    return 4 * 1024 * 1024, 32 * 1024 * 1024        # v7x: 64 MiB physical VMEM


def _choose_tiles(total_rows, hw, itemsize, budget):
    """Pick a (rows, lanes) block for a row-major (total_rows, hw) array.

    rows is a multiple of 8 (or the full row count) and lanes is a multiple of
    128 (or the full hw), so the (8,128) BlockSpec constraint always holds.
    Prefers full-hw blocks (fully contiguous DMA segments), then grows rows to
    fill the byte budget; otherwise keeps rows at the 8-row quantum and makes
    the lane dimension as wide as the budget allows.
    """
    row_q = _ROW if total_rows % _ROW == 0 else total_rows
    if row_q * hw * itemsize <= budget:
        thw = hw                                              # == full dim -> legal
        rows = (budget // (hw * itemsize)) // row_q * row_q
        rows = max(row_q, min(total_rows, rows))
    else:
        rows = row_q
        thw = max(_LANE, (budget // (rows * itemsize)) // _LANE * _LANE)
        thw = min(thw, hw)                                    # mult-of-128 or == hw
    return rows, thw


def se_attention(x, w1, w2):
    """x: (B, C, H, W);  w1: (C//r, C);  w2: (C, C//r).  Matches SEAttention.forward."""
    B, C, H, W = x.shape
    HW = H * W
    R = B * C
    itemsize = x.dtype.itemsize
    block_budget, vmem_limit = _vmem_config()

    x2 = x.reshape(R, HW)                 # contiguous reshape: metadata only, no copy

    # ---------------- pass 1: squeeze (global average pool as row sums) ----------------
    rows1, thw1 = _choose_tiles(R, HW, itemsize, block_budget)
    n_rows1 = pl.cdiv(R, rows1)
    n_hw1 = pl.cdiv(HW, thw1)
    mask_lanes = (n_hw1 * thw1 != HW)     # partial last spatial tile needs explicit mask

    ones_col = jnp.ones((thw1, 1), dtype=x.dtype)   # resident MXU reduction column

    def _pool_kernel(ones_ref, x_ref, sum_ref):
        s = pl.program_id(1)

        @pl.when(s == 0)
        def _():
            sum_ref[...] = jnp.zeros_like(sum_ref)

        blk = x_ref[...]                                       # (rows1, thw1) native dtype
        if mask_lanes:
            lane = jax.lax.broadcasted_iota(jnp.int32, blk.shape, 1)
            blk = jnp.where(s * thw1 + lane < HW, blk, jnp.zeros_like(blk))
        # MXU handles the reduction + f32 accumulation in an otherwise idle slot.
        sum_ref[...] += jnp.dot(blk, ones_ref[...],
                                preferred_element_type=jnp.float32)

    sums = pl.pallas_call(
        _pool_kernel,
        out_shape=jax.ShapeDtypeStruct((R, 1), jnp.float32),
        grid_spec=pltpu.PrefetchScalarGridSpec(
            num_scalar_prefetch=0,
            grid=(n_rows1, n_hw1),
            in_specs=[
                pl.BlockSpec((thw1, 1), lambda r, s: (0, 0)),       # ones column (resident)
                pl.BlockSpec((rows1, thw1), lambda r, s: (r, s)),   # streamed x tiles
            ],
            out_specs=pl.BlockSpec((rows1, 1), lambda r, s: (r, 0)),  # f32 accumulator
        ),
        compiler_params=pltpu.CompilerParams(
            dimension_semantics=("parallel", "arbitrary"),
            vmem_limit_bytes=vmem_limit),
    )(ones_col, x2)

    # ------------- excitation: tiny (B,C) MLP, hoisted out of the kernels -------------
    pool = sums.reshape(B, C) * jnp.float32(1.0 / HW)
    h = jnp.maximum(jnp.dot(pool, w1.T.astype(jnp.float32),
                            preferred_element_type=jnp.float32), 0.0)
    yv = jax.nn.sigmoid(jnp.dot(h, w2.T.astype(jnp.float32),
                                preferred_element_type=jnp.float32))
    y2 = yv.astype(x.dtype).reshape(R, 1)

    # ---------------- pass 2: broadcast scale (HBM-bound hot loop) ----------------
    # Tiles chosen independently of pass 1 (both already lane-dense and wide).
    rows2, thw2 = _choose_tiles(R, HW, itemsize, block_budget)
    n_rows2 = pl.cdiv(R, rows2)
    n_hw2 = pl.cdiv(HW, thw2)

    def _scale_kernel(y_ref, x_ref, o_ref):
        # y_ref: (rows2, 1); x_ref/o_ref: (rows2, thw2) — native dtype, no f32 upcast.
        # Partial edge blocks: garbage input lanes/rows are multiplied then dropped
        # by Pallas' masked OOB output stores.
        o_ref[...] = x_ref[...] * y_ref[...]

    out2 = pl.pallas_call(
        _scale_kernel,
        out_shape=jax.ShapeDtypeStruct((R, HW), x.dtype),
        grid_spec=pltpu.PrefetchScalarGridSpec(
            num_scalar_prefetch=0,
            grid=(n_rows2, n_hw2),
            in_specs=[
                pl.BlockSpec((rows2, 1), lambda r, s: (r, 0)),
                pl.BlockSpec((rows2, thw2), lambda r, s: (r, s)),
            ],
            out_specs=pl.BlockSpec((rows2, thw2), lambda r, s: (r, s)),
        ),
        compiler_params=pltpu.CompilerParams(
            dimension_semantics=("parallel", "parallel"),
            vmem_limit_bytes=vmem_limit),
    )(y2, x2)

    return out2.reshape(B, C, H, W)       # metadata-only reshape, no slicing copy


def se_attention_ref(x, w1, w2):
    """Pure-JAX reference matching the PyTorch forward."""
    y = jnp.mean(x, axis=(2, 3))                 # adaptive avg pool to 1x1 -> (B, C)
    y = jnp.maximum(y @ w1.T, 0.0)               # Linear(C, C//r, bias=False) + ReLU
    y = jax.nn.sigmoid(y @ w2.T)                 # Linear(C//r, C, bias=False) + Sigmoid
    return x * y[:, :, None, None]


if __name__ == "__main__":
    B, C, H, W = 2, 64, 16, 16
    reduction = 16
    hidden = C // reduction

    key = jax.random.PRNGKey(0)
    kx, k1, k2 = jax.random.split(key, 3)

    x = jax.random.normal(kx, (B, C, H, W), dtype=jnp.float32)
    # Linear weights, deterministic init (std=0.001 like init_weights)
    w1 = 0.001 * jax.random.normal(k1, (hidden, C), dtype=jnp.float32)
    w2 = 0.001 * jax.random.normal(k2, (C, hidden), dtype=jnp.float32)

    se_fn = jax.jit(se_attention)
    out = jax.block_until_ready(se_fn(x, w1, w2))
    ref = se_attention_ref(x, w1, w2)

    assert out.shape == x.shape
    assert jnp.allclose(out, ref, atol=1e-5, rtol=1e-5), "mismatch vs reference"

    print("KERNEL_OK")
</pallas_src>

<mosaic_0001>
module attributes {stable_mosaic.version = 11 : i64} {
  func.func @_pool_kernel(%arg0: i32, %arg1: i32, %arg2: memref<256x1xf32, #tpu.memory_space<vmem>>, %arg3: memref<128x256xf32, #tpu.memory_space<vmem>>, %arg4: memref<128x1xf32, #tpu.memory_space<vmem>>) attributes {dimension_semantics = [#tpu.dimension_semantics<parallel>, #tpu.dimension_semantics<arbitrary>], iteration_bounds = array<i64: 1, 1>, scalar_prefetch = 0 : i64, scratch_operands = 0 : i64, tpu.core_type = #tpu.core_type<tc>, window_params = [{pipeline_mode = #tpu.pipeline_mode<synchronous>, transform_indices = @transform_0, window_bounds = array<i64: 256, 1>}, {transform_indices = @transform_1, window_bounds = array<i64: 128, 256>}, {transform_indices = @transform_2, window_bounds = array<i64: 128, 1>}]} {
    %c0_i32 = arith.constant 0 : i32
    %0 = arith.cmpi eq, %arg1, %c0_i32 : i32
    %1 = arith.extui %0 : i1 to i32
    %c0_i32_0 = arith.constant 0 : i32
    %2 = arith.cmpi ne, %1, %c0_i32_0 : i32
    scf.if %2 {
      %cst_8 = arith.constant 0.000000e+00 : f32
      %9 = vector.broadcast %cst_8 : f32 to vector<128x1xf32>
      %c0_9 = arith.constant 0 : index
      %c0_10 = arith.constant 0 : index
      %10 = vector.load %arg4[%c0_9, %c0_10] : memref<128x1xf32, #tpu.memory_space<vmem>>, vector<128x1xf32>
      tpu.vector_store %arg4[%c0_9, %c0_10], %9 {strides = array<i32>} : memref<128x1xf32, #tpu.memory_space<vmem>>, vector<128x1xf32>,
    } else {
    }
    %c0 = arith.constant 0 : index
    %c0_1 = arith.constant 0 : index
    %3 = vector.load %arg3[%c0, %c0_1] : memref<128x256xf32, #tpu.memory_space<vmem>>, vector<128x256xf32>
    %c0_2 = arith.constant 0 : index
    %c0_3 = arith.constant 0 : index
    %4 = vector.load %arg4[%c0_2, %c0_3] : memref<128x1xf32, #tpu.memory_space<vmem>>, vector<128x1xf32>
    %c0_4 = arith.constant 0 : index
    %c0_5 = arith.constant 0 : index
    %5 = vector.load %arg2[%c0_4, %c0_5] : memref<256x1xf32, #tpu.memory_space<vmem>>, vector<256x1xf32>
    %cst = arith.constant dense<0.000000e+00> : vector<128x1xf32>
    %6 = tpu.matmul %3, %5, %cst {dimension_numbers = #tpu.dot_dimension_numbers<[1], [0], [0], [1], [0, 0, 1, 1], [], []>} : vector<128x256xf32>, vector<256x1xf32>, vector<128x1xf32> -> vector<128x1xf32>
    %7 = arith.addf %4, %6 : vector<128x1xf32>
    %c0_6 = arith.constant 0 : index
    %c0_7 = arith.constant 0 : index
    %8 = vector.load %arg4[%c0_6, %c0_7] : memref<128x1xf32, #tpu.memory_space<vmem>>, vector<128x1xf32>
    tpu.vector_store %arg4[%c0_6, %c0_7], %7 {strides = array<i32>} : memref<128x1xf32, #tpu.memory_space<vmem>>, vector<128x1xf32>,
    return
  }
  func.func @transform_0(%arg0: i32, %arg1: i32) -> (i32, i32) {
    %c0_i32 = arith.constant 0 : i32
    %c0_i32_0 = arith.constant 0 : i32
    %c0_i32_1 = arith.constant 0 : i32
    return %c0_i32, %c0_i32_0 : i32, i32
  }
  func.func @transform_1(%arg0: i32, %arg1: i32) -> (i32, i32) {
    %c0_i32 = arith.constant 0 : i32
    return %arg0, %arg1 : i32, i32
  }
  func.func @transform_2(%arg0: i32, %arg1: i32) -> (i32, i32) {
    %c0_i32 = arith.constant 0 : i32
    %c0_i32_0 = arith.constant 0 : i32
    return %arg0, %c0_i32 : i32, i32
  }
}

module attributes {stable_mosaic.version = 11 : i64} {
  func.func @_scale_kernel(%arg0: i32, %arg1: i32, %arg2: memref<128x1xf32, #tpu.memory_space<vmem>>, %arg3: memref<128x256xf32, #tpu.memory_space<vmem>>, %arg4: memref<128x256xf32, #tpu.memory_space<vmem>>) attributes {dimension_semantics = [#tpu.dimension_semantics<parallel>, #tpu.dimension_semantics<parallel>], iteration_bounds = array<i64: 1, 1>, scalar_prefetch = 0 : i64, scratch_operands = 0 : i64, tpu.core_type = #tpu.core_type<tc>, window_params = [{transform_indices = @transform_0, window_bounds = array<i64: 128, 1>}, {transform_indices = @transform_1, window_bounds = array<i64: 128, 256>}, {transform_indices = @transform_2, window_bounds = array<i64: 128, 256>}]} {
    %c0 = arith.constant 0 : index
    %c0_0 = arith.constant 0 : index
    %0 = vector.load %arg3[%c0, %c0_0] : memref<128x256xf32, #tpu.memory_space<vmem>>, vector<128x256xf32>
    %c0_1 = arith.constant 0 : index
    %c0_2 = arith.constant 0 : index
    %1 = vector.load %arg2[%c0_1, %c0_2] : memref<128x1xf32, #tpu.memory_space<vmem>>, vector<128x1xf32>
    %2 = vector.broadcast %1 : vector<128x1xf32> to vector<128x256xf32>
    %3 = arith.mulf %0, %2 : vector<128x256xf32>
    %c0_3 = arith.constant 0 : index
    %c0_4 = arith.constant 0 : index
    %4 = vector.load %arg4[%c0_3, %c0_4] : memref<128x256xf32, #tpu.memory_space<vmem>>, vector<128x256xf32>
    tpu.vector_store %arg4[%c0_3, %c0_4], %3 {strides = array<i32>} : memref<128x256xf32, #tpu.memory_space<vmem>>, vector<128x256xf32>,
    return
  }
  func.func @transform_0(%arg0: i32, %arg1: i32) -> (i32, i32) {
    %c0_i32 = arith.constant 0 : i32
    %c0_i32_0 = arith.constant 0 : i32
    return %arg0, %c0_i32 : i32, i32
  }
  func.func @transform_1(%arg0: i32, %arg1: i32) -> (i32, i32) {
    %c0_i32 = arith.constant 0 : i32
    return %arg0, %arg1 : i32, i32
  }
  func.func @transform_2(%arg0: i32, %arg1: i32) -> (i32, i32) {
    %c0_i32 = arith.constant 0 : i32
    return %arg0, %arg1 : i32, i32
  }
}

</mosaic_0001>

<bundles_post_ra>
// kernel: se_attention.3
= control target key start
LH: loop header
LB: loop body
LE: loop exit
PB: predicated region body
PF: predicated region fallthrough
CT: control target
= control target key end

     0   :  { %v210_v0 = vmov 0   ;;  %s466_s0 = inlined_call_operand.vmem [shape: f32[128,1], index: 0, kind: input, shape index: {}]   ;;  %s467_s1 = inlined_call_operand.vmem [shape: f32[128,256], index: 1, kind: input, shape index: {}]   ;;  %s468_s2 = inlined_call_operand.vmem [shape: f32[128,256], index: 2, kind: output, shape index: {}]  }
   0x1   :  { %209 = vset.pattern.permute.xlu1 %v210_v0  ;;  %208 = vset.pattern.permute.xlu0 %v210_v0  ;;  %v45_v1 = vld [vmem:[%s466_s0 + $0x10] sm:$0xff]  ;;  %v43_v2 = vld [vmem:[%s466_s0] sm:$0xff]  ;;  %v46_v3 = vld [vmem:[%s466_s0 + $0x18] sm:$0xff] }
   0x2   :  { %71 = vperm.xlu1 %209, %v45_v1   ;;  %61 = vperm.xlu0 %208, %v43_v2   ;;  %v44_v4 = vld [vmem:[%s466_s0 + $0x8] sm:$0xff]  ;;  %v47_v6 = vld [vmem:[%s466_s0 + $0x20] sm:$0xff]  ;;  %v50_v7 = vld [vmem:[%s466_s0 + $0x38] sm:$0xff] }
   0x3   :  { %v48_v5 = vld [vmem:[%s466_s0 + $0x28] sm:$0xff]  ;;  %v49_v8 = vld [vmem:[%s466_s0 + $0x30] sm:$0xff]  ;;  %v51_v10 = vld [vmem:[%s466_s0 + $0x40] sm:$0xff] }
   0x4   :  { %v52_v9 = vld [vmem:[%s466_s0 + $0x48] sm:$0xff]  ;;  %v54_v11 = vld [vmem:[%s466_s0 + $0x58] sm:$0xff]  ;;  %v53_v12 = vld [vmem:[%s466_s0 + $0x50] sm:$0xff] }
   0x5   :  { %v56_v13 = vld [vmem:[%s466_s0 + $0x68] sm:$0xff]  ;;  %v55_v14 = vld [vmem:[%s466_s0 + $0x60] sm:$0xff]  ;;  %v58_v15 = vld [vmem:[%s466_s0 + $0x78] sm:$0xff] }
   0x6   :  { %76 = vperm.xlu1 %209, %v46_v3   ;;  %66 = vperm.xlu0 %208, %v44_v4   ;;  %v57_v16 = vld [vmem:[%s466_s0 + $0x70] sm:$0xff]  ;;  %v15_v17 = vld [vmem:[%s467_s1 + $0x20] sm:$0xff]  ;;  %v16_v18 = vld [vmem:[%s467_s1 + $0x28] sm:$0xff] }
   0x7   :  { %v11_v19 = vld [vmem:[%s467_s1] sm:$0xff]  ;;  %v12_v20 = vld [vmem:[%s467_s1 + $0x8] sm:$0xff]  ;;  %v17_v27 = vld [vmem:[%s467_s1 + $0x30] sm:$0xff] }
   0x8   :  { %v18_v28 = vld [vmem:[%s467_s1 + $0x38] sm:$0xff]  ;;  %v13_v29 = vld [vmem:[%s467_s1 + $0x10] sm:$0xff]  ;;  %v19_v39 = vld [vmem:[%s467_s1 + $0x40] sm:$0xff] }
   0x9   :  { %v14_v30 = vld [vmem:[%s467_s1 + $0x18] sm:$0xff]  ;;  %v21_v37 = vld [vmem:[%s467_s1 + $0x50] sm:$0xff]  ;;  %v20_v40 = vld [vmem:[%s467_s1 + $0x48] sm:$0xff] }
   0xa   :  { %86 = vperm.xlu1 %209, %v48_v5   ;;  %81 = vperm.xlu0 %208, %v47_v6   ;;  %v22_v38 = vld [vmem:[%s467_s1 + $0x58] sm:$0xff]  ;;  %v25_v47 = vld [vmem:[%s467_s1 + $0x70] sm:$0xff]  ;;  %v23_v49 = vld [vmem:[%s467_s1 + $0x60] sm:$0xff] }
   0xb   :  { %v26_v48 = vld [vmem:[%s467_s1 + $0x78] sm:$0xff]  ;;  %v24_v50 = vld [vmem:[%s467_s1 + $0x68] sm:$0xff]  ;;  %v29_v57 = vld [vmem:[%s467_s1 + $0x90] sm:$0xff] }
   0xc   :  { %v30_v58 = vld [vmem:[%s467_s1 + $0x98] sm:$0xff]  ;;  %v27_v59 = vld [vmem:[%s467_s1 + $0x80] sm:$0xff]  ;;  %v28_v60 = vld [vmem:[%s467_s1 + $0x88] sm:$0xff] }
   0xd   :  { %v33_v3 = vld [vmem:[%s467_s1 + $0xb0] sm:$0xff]  ;;  %v34_v4 = vld [vmem:[%s467_s1 + $0xb8] sm:$0xff]  ;;  %v31_v5 = vld [vmem:[%s467_s1 + $0xa0] sm:$0xff] }
   0xe   :  { %96 = vperm.xlu1 %209, %v50_v7   ;;  %91 = vperm.xlu0 %208, %v49_v8   ;;  %v32_v6 = vld [vmem:[%s467_s1 + $0xa8] sm:$0xff] }
  0x12   :  { %106 = vperm.xlu1 %209, %v52_v9   ;;  %101 = vperm.xlu0 %208, %v51_v10  }
  0x16   :  { %116 = vperm.xlu1 %209, %v54_v11   ;;  %111 = vperm.xlu0 %208, %v53_v12  }
  0x1a   :  { %126 = vperm.xlu1 %209, %v56_v13   ;;  %121 = vperm.xlu0 %208, %v55_v14   ;;  %v37_v13 = vld [vmem:[%s467_s1 + $0xd0] sm:$0xff]  ;;  %v38_v14 = vld [vmem:[%s467_s1 + $0xd8] sm:$0xff] }
  0x1e   :  { %136 = vperm.xlu1 %209, %v58_v15   ;;  %131 = vperm.xlu0 %208, %v57_v16   ;;  %v35_v15 = vld [vmem:[%s467_s1 + $0xc0] sm:$0xff]  ;;  %v36_v16 = vld [vmem:[%s467_s1 + $0xc8] sm:$0xff] }
  0x7d   :  { %v72_v21 = vpop.permute.xlu1 %71  ;;  %v62_v22 = vpop.permute.xlu0 %61 }
  0x7e   :  { %v143_v23 = vmul.f32 %v72_v21, %v15_v17  ;;  %v144_v24 = vmul.f32 %v72_v21, %v16_v18  ;;  %v139_v25 = vmul.f32 %v62_v22, %v11_v19  ;;  %v140_v26 = vmul.f32 %v62_v22, %v12_v20 }
  0x80   :  { %175 = vst [vmem:[%s468_s2 + $0x20] sm:$0xff] %v143_v23  ;;  %176 = vst [vmem:[%s468_s2 + $0x28] sm:$0xff] %v144_v24  ;;  %v41_v23 = vld [vmem:[%s467_s1 + $0xf0] sm:$0xff]  ;;  %v42_v24 = vld [vmem:[%s467_s1 + $0xf8] sm:$0xff] }
  0x81   :  { %171 = vst [vmem:[%s468_s2] sm:$0xff] %v139_v25  ;;  %172 = vst [vmem:[%s468_s2 + $0x8] sm:$0xff] %v140_v26  ;;  %v77_v31 = vpop.permute.xlu1 %76  ;;  %v67_v32 = vpop.permute.xlu0 %66  ;;  %v39_v25 = vld [vmem:[%s467_s1 + $0xe0] sm:$0xff]  ;;  %v40_v26 = vld [vmem:[%s467_s1 + $0xe8] sm:$0xff] }
  0x82   :  { %v145_v33 = vmul.f32 %v77_v31, %v17_v27  ;;  %v146_v34 = vmul.f32 %v77_v31, %v18_v28  ;;  %v141_v35 = vmul.f32 %v67_v32, %v13_v29  ;;  %v142_v36 = vmul.f32 %v67_v32, %v14_v30 }
  0x84   :  { %177 = vst [vmem:[%s468_s2 + $0x30] sm:$0xff] %v145_v33  ;;  %178 = vst [vmem:[%s468_s2 + $0x38] sm:$0xff] %v146_v34 }
  0x85   :  { %173 = vst [vmem:[%s468_s2 + $0x10] sm:$0xff] %v141_v35  ;;  %174 = vst [vmem:[%s468_s2 + $0x18] sm:$0xff] %v142_v36  ;;  %v87_v41 = vpop.permute.xlu1 %86  ;;  %v82_v42 = vpop.permute.xlu0 %81 }
  0x86   :  { %v149_v43 = vmul.f32 %v87_v41, %v21_v37  ;;  %v150_v44 = vmul.f32 %v87_v41, %v22_v38  ;;  %v147_v45 = vmul.f32 %v82_v42, %v19_v39  ;;  %v148_v46 = vmul.f32 %v82_v42, %v20_v40 }
  0x88   :  { %181 = vst [vmem:[%s468_s2 + $0x50] sm:$0xff] %v149_v43  ;;  %182 = vst [vmem:[%s468_s2 + $0x58] sm:$0xff] %v150_v44 }
  0x89   :  { %179 = vst [vmem:[%s468_s2 + $0x40] sm:$0xff] %v147_v45  ;;  %180 = vst [vmem:[%s468_s2 + $0x48] sm:$0xff] %v148_v46  ;;  %v97_v51 = vpop.permute.xlu1 %96  ;;  %v92_v52 = vpop.permute.xlu0 %91 }
  0x8a   :  { %v153_v53 = vmul.f32 %v97_v51, %v25_v47  ;;  %v154_v54 = vmul.f32 %v97_v51, %v26_v48  ;;  %v151_v55 = vmul.f32 %v92_v52, %v23_v49  ;;  %v152_v56 = vmul.f32 %v92_v52, %v24_v50 }
  0x8c   :  { %185 = vst [vmem:[%s468_s2 + $0x70] sm:$0xff] %v153_v53  ;;  %186 = vst [vmem:[%s468_s2 + $0x78] sm:$0xff] %v154_v54 }
  0x8d   :  { %183 = vst [vmem:[%s468_s2 + $0x60] sm:$0xff] %v151_v55  ;;  %184 = vst [vmem:[%s468_s2 + $0x68] sm:$0xff] %v152_v56  ;;  %v107_v61 = vpop.permute.xlu1 %106  ;;  %v102_v62 = vpop.permute.xlu0 %101 }
  0x8e   :  { %v157_v63 = vmul.f32 %v107_v61, %v29_v57  ;;  %v158_v0 = vmul.f32 %v107_v61, %v30_v58  ;;  %v155_v1 = vmul.f32 %v102_v62, %v27_v59  ;;  %v156_v2 = vmul.f32 %v102_v62, %v28_v60 }
  0x90   :  { %189 = vst [vmem:[%s468_s2 + $0x90] sm:$0xff] %v157_v63  ;;  %190 = vst [vmem:[%s468_s2 + $0x98] sm:$0xff] %v158_v0 }
  0x91   :  { %187 = vst [vmem:[%s468_s2 + $0x80] sm:$0xff] %v155_v1  ;;  %188 = vst [vmem:[%s468_s2 + $0x88] sm:$0xff] %v156_v2  ;;  %v117_v7 = vpop.permute.xlu1 %116  ;;  %v112_v8 = vpop.permute.xlu0 %111 }
  0x92   :  { %v161_v9 = vmul.f32 %v117_v7, %v33_v3  ;;  %v162_v10 = vmul.f32 %v117_v7, %v34_v4  ;;  %v159_v11 = vmul.f32 %v112_v8, %v31_v5  ;;  %v160_v12 = vmul.f32 %v112_v8, %v32_v6 }
  0x94   :  { %193 = vst [vmem:[%s468_s2 + $0xb0] sm:$0xff] %v161_v9  ;;  %194 = vst [vmem:[%s468_s2 + $0xb8] sm:$0xff] %v162_v10 }
  0x95   :  { %191 = vst [vmem:[%s468_s2 + $0xa0] sm:$0xff] %v159_v11  ;;  %192 = vst [vmem:[%s468_s2 + $0xa8] sm:$0xff] %v160_v12  ;;  %v127_v17 = vpop.permute.xlu1 %126  ;;  %v122_v18 = vpop.permute.xlu0 %121 }
  0x96   :  { %v165_v19 = vmul.f32 %v127_v17, %v37_v13  ;;  %v166_v20 = vmul.f32 %v127_v17, %v38_v14  ;;  %v163_v21 = vmul.f32 %v122_v18, %v35_v15  ;;  %v164_v22 = vmul.f32 %v122_v18, %v36_v16 }
  0x98   :  { %197 = vst [vmem:[%s468_s2 + $0xd0] sm:$0xff] %v165_v19  ;;  %198 = vst [vmem:[%s468_s2 + $0xd8] sm:$0xff] %v166_v20 }
  0x99   :  { %195 = vst [vmem:[%s468_s2 + $0xc0] sm:$0xff] %v163_v21  ;;  %196 = vst [vmem:[%s468_s2 + $0xc8] sm:$0xff] %v164_v22  ;;  %v137_v27 = vpop.permute.xlu1 %136  ;;  %v132_v28 = vpop.permute.xlu0 %131 }
  0x9a   :  { %v169_v29 = vmul.f32 %v137_v27, %v41_v23  ;;  %v170_v30 = vmul.f32 %v137_v27, %v42_v24  ;;  %v167_v31 = vmul.f32 %v132_v28, %v39_v25  ;;  %v168_v32 = vmul.f32 %v132_v28, %v40_v26 }
  0x9c   :  { %201 = vst [vmem:[%s468_s2 + $0xf0] sm:$0xff] %v169_v29  ;;  %202 = vst [vmem:[%s468_s2 + $0xf8] sm:$0xff] %v170_v30 }
  0x9d   :  { %199 = vst [vmem:[%s468_s2 + $0xe0] sm:$0xff] %v167_v31  ;;  %200 = vst [vmem:[%s468_s2 + $0xe8] sm:$0xff] %v168_v32 }

// kernel: se_attention.2
= control target key start
LH: loop header
LB: loop body
LE: loop exit
PB: predicated region body
PF: predicated region fallthrough
CT: control target
= control target key end

     0   :  { %vm15_vm0 = vcmask 7168   ;;  %s791_s0 = inlined_call_operand.vmem [shape: f32[256,1], index: 0, kind: input, shape index: {}]   ;;  %s792_s1 = inlined_call_operand.vmem [shape: f32[128,256], index: 1, kind: input, shape index: {}]   ;;  %s793_s2 = inlined_call_operand.vmem [shape: f32[128,1], index: 2, kind: output, shape index: {}]  }
   0x1   :  { %v111_v0 = vld [vmem:[%s791_s0 + $0xf8] sm:$0xff]  ;;  %v110_v2 = vld [vmem:[%s791_s0 + $0xf0] sm:$0xff]  ;;  %v109_v4 = vld [vmem:[%s791_s0 + $0xe8] sm:$0xff] }
   0x2   :  { %v95_v1 = vld [vmem:[%s791_s0 + $0x78] sm:$0xff]  ;;  %294 = vmatprep.subr.mxu0 %v111_v0  ;;  %374 = vmatprep.subr.mxu1 %v111_v0  ;;  %v94_v3 = vld [vmem:[%s791_s0 + $0x70] sm:$0xff]  ;;  %v93_v5 = vld [vmem:[%s791_s0 + $0x68] sm:$0xff]  ;;  %v407_v0 = vmov 0.0  }
   0x3   :  { %295 = vmatpush3.msra.mxu0 %v95_v1  ;;  %390 = vmatpush3.msra.mxu1 %v95_v1  ;;  %v108_v6 = vld [vmem:[%s791_s0 + $0xe0] sm:$0xff]  ;;  %v107_v8 = vld [vmem:[%s791_s0 + $0xd8] sm:$0xff]  ;;  %v106_v10 = vld [vmem:[%s791_s0 + $0xd0] sm:$0xff]  ;;  %16 = vst.msk [vmem:[%s793_s2] sm:$0xff] %vm15_vm0, %v407_v0 }
   0x4   :  { %296 = vmatprep.subr.mxu0 %v110_v2  ;;  %375 = vmatprep.subr.mxu1 %v110_v2  ;;  %v92_v7 = vld [vmem:[%s791_s0 + $0x60] sm:$0xff]  ;;  %v91_v9 = vld [vmem:[%s791_s0 + $0x58] sm:$0xff]  ;;  %v90_v11 = vld [vmem:[%s791_s0 + $0x50] sm:$0xff]  ;;  %17 = vst.msk [vmem:[%s793_s2 + $0x8] sm:$0xff] %vm15_vm0, %v407_v0 }
   0x5   :  { %297 = vmatpush3.msra.mxu0 %v94_v3  ;;  %391 = vmatpush3.msra.mxu1 %v94_v3  ;;  %v105_v12 = vld [vmem:[%s791_s0 + $0xc8] sm:$0xff]  ;;  %v104_v14 = vld [vmem:[%s791_s0 + $0xc0] sm:$0xff]  ;;  %v103_v16 = vld [vmem:[%s791_s0 + $0xb8] sm:$0xff]  ;;  %18 = vst.msk [vmem:[%s793_s2 + $0x10] sm:$0xff] %vm15_vm0, %v407_v0 }
   0x6   :  { %298 = vmatprep.subr.mxu0 %v109_v4  ;;  %376 = vmatprep.subr.mxu1 %v109_v4  ;;  %v89_v13 = vld [vmem:[%s791_s0 + $0x48] sm:$0xff]  ;;  %v88_v15 = vld [vmem:[%s791_s0 + $0x40] sm:$0xff]  ;;  %v87_v17 = vld [vmem:[%s791_s0 + $0x38] sm:$0xff]  ;;  %19 = vst.msk [vmem:[%s793_s2 + $0x18] sm:$0xff] %vm15_vm0, %v407_v0 }
   0x7   :  { %299 = vmatpush3.msra.mxu0 %v93_v5  ;;  %392 = vmatpush3.msra.mxu1 %v93_v5  ;;  %v102_v18 = vld [vmem:[%s791_s0 + $0xb0] sm:$0xff]  ;;  %v101_v20 = vld [vmem:[%s791_s0 + $0xa8] sm:$0xff]  ;;  %v100_v22 = vld [vmem:[%s791_s0 + $0xa0] sm:$0xff]  ;;  %20 = vst.msk [vmem:[%s793_s2 + $0x20] sm:$0xff] %vm15_vm0, %v407_v0 }
   0x8   :  { %300 = vmatprep.subr.mxu0 %v108_v6  ;;  %377 = vmatprep.subr.mxu1 %v108_v6  ;;  %v86_v19 = vld [vmem:[%s791_s0 + $0x30] sm:$0xff]  ;;  %v85_v21 = vld [vmem:[%s791_s0 + $0x28] sm:$0xff]  ;;  %v84_v23 = vld [vmem:[%s791_s0 + $0x20] sm:$0xff]  ;;  %21 = vst.msk [vmem:[%s793_s2 + $0x28] sm:$0xff] %vm15_vm0, %v407_v0 }
   0x9   :  { %301 = vmatpush3.msra.mxu0 %v92_v7  ;;  %393 = vmatpush3.msra.mxu1 %v92_v7  ;;  %v99_v24 = vld [vmem:[%s791_s0 + $0x98] sm:$0xff]  ;;  %v98_v26 = vld [vmem:[%s791_s0 + $0x90] sm:$0xff]  ;;  %v97_v28 = vld [vmem:[%s791_s0 + $0x88] sm:$0xff]  ;;  %22 = vst.msk [vmem:[%s793_s2 + $0x30] sm:$0xff] %vm15_vm0, %v407_v0 }
   0xa   :  { %302 = vmatprep.subr.mxu0 %v107_v8  ;;  %378 = vmatprep.subr.mxu1 %v107_v8  ;;  %v83_v25 = vld [vmem:[%s791_s0 + $0x18] sm:$0xff]  ;;  %v82_v27 = vld [vmem:[%s791_s0 + $0x10] sm:$0xff]  ;;  %v81_v29 = vld [vmem:[%s791_s0 + $0x8] sm:$0xff]  ;;  %23 = vst.msk [vmem:[%s793_s2 + $0x38] sm:$0xff] %vm15_vm0, %v407_v0 }
   0xb   :  { %303 = vmatpush3.msra.mxu0 %v91_v9  ;;  %394 = vmatpush3.msra.mxu1 %v91_v9  ;;  %v96_v30 = vld [vmem:[%s791_s0 + $0x80] sm:$0xff]  ;;  %v33_v32 = vld [vmem:[%s792_s1 + $0x8] sm:$0xff]  ;;  %v35_v36 = vld [vmem:[%s792_s1 + $0x18] sm:$0xff]  ;;  %24 = vst.msk [vmem:[%s793_s2 + $0x40] sm:$0xff] %vm15_vm0, %v407_v0 }
   0xc   :  { %304 = vmatprep.subr.mxu0 %v106_v10  ;;  %379 = vmatprep.subr.mxu1 %v106_v10  ;;  %v80_v31 = vld [vmem:[%s791_s0] sm:$0xff]  ;;  %v49_v33 = vld [vmem:[%s792_s1 + $0x88] sm:$0xff]  ;;  %v51_v37 = vld [vmem:[%s792_s1 + $0x98] sm:$0xff]  ;;  %25 = vst.msk [vmem:[%s793_s2 + $0x48] sm:$0xff] %vm15_vm0, %v407_v0 }
   0xd   :  { %305 = vmatpush3.msra.mxu0 %v90_v11  ;;  %395 = vmatpush3.msra.mxu1 %v90_v11  ;;  %v32_v34 = vld [vmem:[%s792_s1] sm:$0xff]  ;;  %v34_v38 = vld [vmem:[%s792_s1 + $0x10] sm:$0xff]  ;;  %v37_v40 = vld [vmem:[%s792_s1 + $0x28] sm:$0xff]  ;;  %26 = vst.msk [vmem:[%s793_s2 + $0x50] sm:$0xff] %vm15_vm0, %v407_v0 }
   0xe   :  { %306 = vmatprep.subr.mxu0 %v105_v12  ;;  %380 = vmatprep.subr.mxu1 %v105_v12  ;;  %v48_v35 = vld [vmem:[%s792_s1 + $0x80] sm:$0xff]  ;;  %v50_v39 = vld [vmem:[%s792_s1 + $0x90] sm:$0xff]  ;;  %v53_v41 = vld [vmem:[%s792_s1 + $0xa8] sm:$0xff]  ;;  %27 = vst.msk [vmem:[%s793_s2 + $0x58] sm:$0xff] %vm15_vm0, %v407_v0 }
   0xf   :  { %307 = vmatpush3.msra.mxu0 %v89_v13  ;;  %396 = vmatpush3.msra.mxu1 %v89_v13  ;;  %v36_v42 = vld [vmem:[%s792_s1 + $0x20] sm:$0xff]  ;;  %v39_v44 = vld [vmem:[%s792_s1 + $0x38] sm:$0xff]  ;;  %v38_v46 = vld [vmem:[%s792_s1 + $0x30] sm:$0xff]  ;;  %28 = vst.msk [vmem:[%s793_s2 + $0x60] sm:$0xff] %vm15_vm0, %v407_v0 }
  0x10   :  { %308 = vmatprep.subr.mxu0 %v104_v14  ;;  %381 = vmatprep.subr.mxu1 %v104_v14  ;;  %v52_v43 = vld [vmem:[%s792_s1 + $0xa0] sm:$0xff]  ;;  %v55_v45 = vld [vmem:[%s792_s1 + $0xb8] sm:$0xff]  ;;  %v54_v47 = vld [vmem:[%s792_s1 + $0xb0] sm:$0xff]  ;;  %29 = vst.msk [vmem:[%s793_s2 + $0x68] sm:$0xff] %vm15_vm0, %v407_v0 }
  0x11   :  { %309 = vmatpush3.msra.mxu0 %v88_v15  ;;  %397 = vmatpush3.msra.mxu1 %v88_v15  ;;  %v41_v48 = vld [vmem:[%s792_s1 + $0x48] sm:$0xff]  ;;  %v40_v50 = vld [vmem:[%s792_s1 + $0x40] sm:$0xff]  ;;  %v43_v52 = vld [vmem:[%s792_s1 + $0x58] sm:$0xff]  ;;  %30 = vst.msk [vmem:[%s793_s2 + $0x70] sm:$0xff] %vm15_vm0, %v407_v0 }
  0x12   :  { %310 = vmatprep.subr.mxu0 %v103_v16  ;;  %382 = vmatprep.subr.mxu1 %v103_v16  ;;  %v57_v49 = vld [vmem:[%s792_s1 + $0xc8] sm:$0xff]  ;;  %v56_v51 = vld [vmem:[%s792_s1 + $0xc0] sm:$0xff]  ;;  %v59_v53 = vld [vmem:[%s792_s1 + $0xd8] sm:$0xff]  ;;  %31 = vst.msk [vmem:[%s793_s2 + $0x78] sm:$0xff] %vm15_vm0, %v407_v0 }
  0x13   :  { %311 = vmatpush3.msra.mxu0 %v87_v17  ;;  %398 = vmatpush3.msra.mxu1 %v87_v17  ;;  %v42_v54 = vld [vmem:[%s792_s1 + $0x50] sm:$0xff]  ;;  %v45_v56 = vld [vmem:[%s792_s1 + $0x68] sm:$0xff]  ;;  %v44_v58 = vld [vmem:[%s792_s1 + $0x60] sm:$0xff] }
  0x14   :  { %312 = vmatprep.subr.mxu0 %v102_v18  ;;  %383 = vmatprep.subr.mxu1 %v102_v18  ;;  %v58_v55 = vld [vmem:[%s792_s1 + $0xd0] sm:$0xff]  ;;  %v61_v57 = vld [vmem:[%s792_s1 + $0xe8] sm:$0xff]  ;;  %v60_v59 = vld [vmem:[%s792_s1 + $0xe0] sm:$0xff] }
  0x15   :  { %313 = vmatpush3.msra.mxu0 %v86_v19  ;;  %399 = vmatpush3.msra.mxu1 %v86_v19  ;;  %v47_v60 = vld [vmem:[%s792_s1 + $0x78] sm:$0xff]  ;;  %v46_v62 = vld [vmem:[%s792_s1 + $0x70] sm:$0xff]  ;;  %v64_v3 = vld [vmem:[%s793_s2] sm:$0xff] }
  0x16   :  { %314 = vmatprep.subr.mxu0 %v101_v20  ;;  %384 = vmatprep.subr.mxu1 %v101_v20  ;;  %v63_v61 = vld [vmem:[%s792_s1 + $0xf8] sm:$0xff]  ;;  %v62_v63 = vld [vmem:[%s792_s1 + $0xf0] sm:$0xff]  ;;  %v72_v5 = vld [vmem:[%s793_s2 + $0x40] sm:$0xff] }
  0x17   :  { %315 = vmatpush3.msra.mxu0 %v85_v21  ;;  %400 = vmatpush3.msra.mxu1 %v85_v21  ;;  %v65_v13 = vld [vmem:[%s793_s2 + $0x8] sm:$0xff] }
  0x18   :  { %316 = vmatprep.subr.mxu0 %v100_v22  ;;  %385 = vmatprep.subr.mxu1 %v100_v22  ;;  %v73_v15 = vld [vmem:[%s793_s2 + $0x48] sm:$0xff] }
  0x19   :  { %317 = vmatpush3.msra.mxu0 %v84_v23  ;;  %401 = vmatpush3.msra.mxu1 %v84_v23  ;;  %v66_v23 = vld [vmem:[%s793_s2 + $0x10] sm:$0xff] }
  0x1a   :  { %318 = vmatprep.subr.mxu0 %v99_v24  ;;  %386 = vmatprep.subr.mxu1 %v99_v24 }
  0x1b   :  { %319 = vmatpush3.msra.mxu0 %v83_v25  ;;  %402 = vmatpush3.msra.mxu1 %v83_v25  ;;  %v74_v25 = vld [vmem:[%s793_s2 + $0x50] sm:$0xff] }
  0x1c   :  { %320 = vmatprep.subr.mxu0 %v98_v26  ;;  %387 = vmatprep.subr.mxu1 %v98_v26 }
  0x1d   :  { %321 = vmatpush3.msra.mxu0 %v82_v27  ;;  %403 = vmatpush3.msra.mxu1 %v82_v27 }
  0x1e   :  { %322 = vmatprep.subr.mxu0 %v97_v28  ;;  %388 = vmatprep.subr.mxu1 %v97_v28 }
  0x1f   :  { %323 = vmatpush3.msra.mxu0 %v81_v29  ;;  %404 = vmatpush3.msra.mxu1 %v81_v29 }
  0x20   :  { %324 = vmatprep.subr.mxu0 %v96_v30  ;;  %389 = vmatprep.subr.mxu1 %v96_v30 }
  0x21   :  { %325 = vmatpush3.msra.mxu0 %v80_v31  ;;  %405 = vmatpush3.msra.mxu1 %v80_v31 }
  0x22   :  { %176 = vmatprep.mubr.f32.mxu0 %v33_v32  ;;  %216 = vmatprep.mubr.f32.mxu1 %v49_v33  ;;  %v67_v33 = vld [vmem:[%s793_s2 + $0x18] sm:$0xff] }
  0x23   :  { %177 = vmatmul.mubr.f32.vlgmr.msra.gmra.mxu0 %v32_v34  ;;  %217 = vmatmul.mubr.f32.vlgmr.msra.gmra.mxu1 %v48_v35  ;;  %v75_v35 = vld [vmem:[%s793_s2 + $0x58] sm:$0xff] }
  0x24   :  { %181 = vmatprep.mubr.f32.mxu0 %v35_v36  ;;  %221 = vmatprep.mubr.f32.mxu1 %v51_v37 }
  0x27   :  { %182 = vmatmul.mubr.f32.gmra.mxu0 %v34_v38  ;;  %222 = vmatmul.mubr.f32.gmra.mxu1 %v50_v39 }
  0x28   :  { %186 = vmatprep.mubr.f32.mxu0 %v37_v40  ;;  %226 = vmatprep.mubr.f32.mxu1 %v53_v41 }
  0x2b   :  { %187 = vmatmul.mubr.f32.gmra.mxu0 %v36_v42  ;;  %227 = vmatmul.mubr.f32.gmra.mxu1 %v52_v43  ;;  %v68_v43 = vld [vmem:[%s793_s2 + $0x20] sm:$0xff] }
  0x2c   :  { %191 = vmatprep.mubr.f32.mxu0 %v39_v44  ;;  %231 = vmatprep.mubr.f32.mxu1 %v55_v45  ;;  %v76_v45 = vld [vmem:[%s793_s2 + $0x60] sm:$0xff] }
  0x2f   :  { %192 = vmatmul.mubr.f32.gmra.mxu0 %v38_v46  ;;  %232 = vmatmul.mubr.f32.gmra.mxu1 %v54_v47 }
  0x30   :  { %196 = vmatprep.mubr.f32.mxu0 %v41_v48  ;;  %236 = vmatprep.mubr.f32.mxu1 %v57_v49 }
  0x33   :  { %197 = vmatmul.mubr.f32.gmra.mxu0 %v40_v50  ;;  %237 = vmatmul.mubr.f32.gmra.mxu1 %v56_v51 }
  0x34   :  { %201 = vmatprep.mubr.f32.mxu0 %v43_v52  ;;  %241 = vmatprep.mubr.f32.mxu1 %v59_v53  ;;  %v69_v53 = vld [vmem:[%s793_s2 + $0x28] sm:$0xff] }
  0x37   :  { %202 = vmatmul.mubr.f32.gmra.mxu0 %v42_v54  ;;  %242 = vmatmul.mubr.f32.gmra.mxu1 %v58_v55  ;;  %v77_v55 = vld [vmem:[%s793_s2 + $0x68] sm:$0xff] }
  0x38   :  { %206 = vmatprep.mubr.f32.mxu0 %v45_v56  ;;  %246 = vmatprep.mubr.f32.mxu1 %v61_v57 }
  0x3b   :  { %207 = vmatmul.mubr.f32.gmra.mxu0 %v44_v58  ;;  %247 = vmatmul.mubr.f32.gmra.mxu1 %v60_v59 }
  0x3c   :  { %211 = vmatprep.mubr.f32.mxu0 %v47_v60  ;;  %251 = vmatprep.mubr.f32.mxu1 %v63_v61 }
  0x3f   :  { %212 = vmatmul.mubr.f32.gmra.mxu0 %v46_v62  ;;  %252 = vmatmul.mubr.f32.gmra.mxu1 %v62_v63  ;;  %v70_v63 = vld [vmem:[%s793_s2 + $0x30] sm:$0xff] }
  0xe3   :  { %v326_v1 = vpop.f32.mrf.mxu0  ;;  %v350_v2 = vpop.f32.mrf.mxu1 }
  0xe5   :  { %v327_v4 = vpop.f32.mrf.mxu0  ;;  %v351_v6 = vpop.f32.mrf.mxu1 }
  0xe6   :  { %v328_v7 = vadd.f32 %v327_v4, %v326_v1  ;;  %v352_v8 = vadd.f32 %v351_v6, %v350_v2  ;;  %v78_v1 = vld [vmem:[%s793_s2 + $0x70] sm:$0xff] }
  0xe7   :  { %v329_v9 = vpop.f32.mrf.mxu0  ;;  %v353_v10 = vpop.f32.mrf.mxu1 }
  0xe8   :  { %v257_v11 = vadd.f32 %v328_v7, %v64_v3  ;;  %v265_v12 = vadd.f32 %v352_v8, %v72_v5 }
  0xe9   :  { %v330_v14 = vpop.f32.mrf.mxu0  ;;  %v354_v16 = vpop.f32.mrf.mxu1 }
  0xea   :  { %274 = vst.msk [vmem:[%s793_s2] sm:$0xff] %vm15_vm0, %v257_v11  ;;  %282 = vst.msk [vmem:[%s793_s2 + $0x40] sm:$0xff] %vm15_vm0, %v265_v12  ;;  %v331_v17 = vadd.f32 %v330_v14, %v329_v9  ;;  %v355_v18 = vadd.f32 %v354_v16, %v353_v10  ;;  %v71_v9 = vld [vmem:[%s793_s2 + $0x38] sm:$0xff] }
  0xeb   :  { %v332_v19 = vpop.f32.mrf.mxu0  ;;  %v356_v20 = vpop.f32.mrf.mxu1  ;;  %v79_v11 = vld [vmem:[%s793_s2 + $0x78] sm:$0xff] }
  0xec   :  { %v258_v21 = vadd.f32 %v331_v17, %v65_v13  ;;  %v266_v22 = vadd.f32 %v355_v18, %v73_v15 }
  0xed   :  { %v333_v24 = vpop.f32.mrf.mxu0  ;;  %v357_v26 = vpop.f32.mrf.mxu1 }
  0xee   :  { %275 = vst.msk [vmem:[%s793_s2 + $0x8] sm:$0xff] %vm15_vm0, %v258_v21  ;;  %283 = vst.msk [vmem:[%s793_s2 + $0x48] sm:$0xff] %vm15_vm0, %v266_v22  ;;  %v334_v27 = vadd.f32 %v333_v24, %v332_v19  ;;  %v358_v28 = vadd.f32 %v357_v26, %v356_v20 }
  0xef   :  { %v335_v29 = vpop.f32.mrf.mxu0  ;;  %v359_v30 = vpop.f32.mrf.mxu1 }
  0xf0   :  { %v259_v31 = vadd.f32 %v334_v27, %v66_v23  ;;  %v267_v32 = vadd.f32 %v358_v28, %v74_v25 }
  0xf1   :  { %v336_v34 = vpop.f32.mrf.mxu0  ;;  %v360_v36 = vpop.f32.mrf.mxu1 }
  0xf2   :  { %276 = vst.msk [vmem:[%s793_s2 + $0x10] sm:$0xff] %vm15_vm0, %v259_v31  ;;  %284 = vst.msk [vmem:[%s793_s2 + $0x50] sm:$0xff] %vm15_vm0, %v267_v32  ;;  %v337_v37 = vadd.f32 %v336_v34, %v335_v29  ;;  %v361_v38 = vadd.f32 %v360_v36, %v359_v30 }
  0xf3   :  { %v338_v39 = vpop.f32.mrf.mxu0  ;;  %v362_v40 = vpop.f32.mrf.mxu1 }
  0xf4   :  { %v260_v41 = vadd.f32 %v337_v37, %v67_v33  ;;  %v268_v42 = vadd.f32 %v361_v38, %v75_v35 }
  0xf5   :  { %v339_v44 = vpop.f32.mrf.mxu0  ;;  %v363_v46 = vpop.f32.mrf.mxu1 }
  0xf6   :  { %277 = vst.msk [vmem:[%s793_s2 + $0x18] sm:$0xff] %vm15_vm0, %v260_v41  ;;  %285 = vst.msk [vmem:[%s793_s2 + $0x58] sm:$0xff] %vm15_vm0, %v268_v42  ;;  %v340_v47 = vadd.f32 %v339_v44, %v338_v39  ;;  %v364_v48 = vadd.f32 %v363_v46, %v362_v40 }
  0xf7   :  { %v341_v49 = vpop.f32.mrf.mxu0  ;;  %v365_v50 = vpop.f32.mrf.mxu1 }
  0xf8   :  { %v261_v51 = vadd.f32 %v340_v47, %v68_v43  ;;  %v269_v52 = vadd.f32 %v364_v48, %v76_v45 }
  0xf9   :  { %v342_v54 = vpop.f32.mrf.mxu0  ;;  %v366_v56 = vpop.f32.mrf.mxu1 }
  0xfa   :  { %278 = vst.msk [vmem:[%s793_s2 + $0x20] sm:$0xff] %vm15_vm0, %v261_v51  ;;  %286 = vst.msk [vmem:[%s793_s2 + $0x60] sm:$0xff] %vm15_vm0, %v269_v52  ;;  %v343_v57 = vadd.f32 %v342_v54, %v341_v49  ;;  %v367_v58 = vadd.f32 %v366_v56, %v365_v50 }
  0xfb   :  { %v344_v59 = vpop.f32.mrf.mxu0  ;;  %v368_v60 = vpop.f32.mrf.mxu1 }
  0xfc   :  { %v262_v61 = vadd.f32 %v343_v57, %v69_v53  ;;  %v270_v62 = vadd.f32 %v367_v58, %v77_v55 }
  0xfd   :  { %v345_v0 = vpop.f32.mrf.mxu0  ;;  %v369_v2 = vpop.f32.mrf.mxu1 }
  0xfe   :  { %279 = vst.msk [vmem:[%s793_s2 + $0x28] sm:$0xff] %vm15_vm0, %v262_v61  ;;  %287 = vst.msk [vmem:[%s793_s2 + $0x68] sm:$0xff] %vm15_vm0, %v270_v62  ;;  %v346_v3 = vadd.f32 %v345_v0, %v344_v59  ;;  %v370_v4 = vadd.f32 %v369_v2, %v368_v60 }
  0xff   :  { %v347_v5 = vpop.f32.mrf.mxu0  ;;  %v371_v6 = vpop.f32.mrf.mxu1 }
 0x100   :  { %v263_v7 = vadd.f32 %v346_v3, %v70_v63  ;;  %v271_v8 = vadd.f32 %v370_v4, %v78_v1 }
 0x101   :  { %v348_v10 = vpop.f32.mrf.mxu0  ;;  %v372_v12 = vpop.f32.mrf.mxu1 }
 0x102   :  { %280 = vst.msk [vmem:[%s793_s2 + $0x30] sm:$0xff] %vm15_vm0, %v263_v7  ;;  %288 = vst.msk [vmem:[%s793_s2 + $0x70] sm:$0xff] %vm15_vm0, %v271_v8  ;;  %v349_v13 = vadd.f32 %v348_v10, %v347_v5  ;;  %v373_v14 = vadd.f32 %v372_v12, %v371_v6 }
 0x104   :  { %v264_v15 = vadd.f32 %v349_v13, %v71_v9  ;;  %v272_v16 = vadd.f32 %v373_v14, %v79_v11 }
 0x106   :  { %281 = vst.msk [vmem:[%s793_s2 + $0x38] sm:$0xff] %vm15_vm0, %v264_v15  ;;  %289 = vst.msk [vmem:[%s793_s2 + $0x78] sm:$0xff] %vm15_vm0, %v272_v16 }

</bundles_post_ra>
